<compile_context>
chip_gen: v7x
topology: tpu7x:2x2x1
jax: 0.10.0
libtpu: 0.0.40
codegen_flags: <defaults>
</compile_context>

<pallas_src>
import math

import jax
import jax.numpy as jnp
from jax.experimental import pallas as pl
from jax.experimental.pallas import tpu as pltpu


def _attention_kernel(x_ref, d_ref, s_ref, w_ref, m_ref, o_ref):
    """All reductions on the MXU; logits/softmax in grouped (Bt, R, P) form; the
    output store is lane-dense (last dim P*C == 128 when C divides 128)."""
    xp = x_ref[...]                                                 # (Bt, R, P*C)
    bt = xp.shape[0]

    # dbar[b, 0, :] = sum_j S[b, j] * dictionary[b, j, :]           (MXU, contract N2)
    dbar = jnp.einsum("bjn,bnc->bjc", s_ref[...], d_ref[...],
                      preferred_element_type=jnp.float32)           # (Bt, 1, C)

    # u_tile[b, 0, l] = (scale/N2) * (dbar @ W2^T @ W1)[b, l % C]   (MXU)
    # w_ref already holds (scale/N2) * (W2^T @ W1) lane-tiled to (C, P*C).
    w = w_ref[...]
    wb = jnp.broadcast_to(w[None, :, :], (bt,) + w.shape)           # (Bt, C, P*C)
    u_tile = jnp.einsum("bjc,bcl->bjl", dbar, wb,
                        preferred_element_type=jnp.float32)         # (Bt, 1, P*C)

    # Grouped logits: logits[b, r, j] = x[b, r*P + j, :] . u[b, :]
    # (full-lane VPU multiply + MXU mask-matmul reduce; T is never materialized).
    xw = xp * u_tile                                                # (Bt, R, P*C)
    mk = m_ref[...]                                                 # (P*C, P)
    mkb = jnp.broadcast_to(mk[None, :, :], (bt,) + mk.shape)        # (Bt, P*C, P)
    logits = jnp.einsum("brl,blj->brj", xw, mkb,
                        preferred_element_type=jnp.float32)         # (Bt, R, P) == tavg

    # Softmax over all N1 positions (the joint (R, P) axes), max-stabilized.
    m = jnp.max(jnp.max(logits, axis=2, keepdims=True), axis=1, keepdims=True)
    e = jnp.exp(logits - m)
    denom = jnp.sum(jnp.sum(e, axis=2, keepdims=True), axis=1, keepdims=True)
    tatt = e / denom                                                # (Bt, R, P)

    # Broadcast the attention back over the C lanes of each token via the same
    # mask (MXU), then apply and store lane-dense.
    tatt_p = jnp.einsum("brj,blj->brl", tatt, mkb,
                        preferred_element_type=jnp.float32)         # (Bt, R, P*C)
    o_ref[...] = (xp * tatt_p).astype(o_ref.dtype)


def _round_up(v, m):
    return ((v + m - 1) // m) * m


def _padded_block_bytes(shape, itemsize, sublane=8):
    """VMEM bytes of one buffer of a >=2D block, honoring (8, 128) tile padding."""
    lead = 1
    for d in shape[:-2]:
        lead *= d
    return lead * _round_up(shape[-2], sublane) * _round_up(shape[-1], 128) * itemsize


def _pick_block_b(B, streamed_2d_shapes, fixed_2d_shapes, itemsize,
                  vmem_budget_bytes=20 * 1024 * 1024):
    """Largest divisor of B whose double-buffered, tile-padded streamed blocks fit
    the VMEM budget while keeping >= 2 grid steps per TensorCore (2 TCs assumed,
    i.e. v7x) so the BlockSpec pipeline can hide the input/output DMAs."""
    fixed = sum(2 * _padded_block_bytes(s, itemsize) for s in fixed_2d_shapes)
    budget = max(vmem_budget_bytes - fixed, 1)
    min_steps = min(B, 4)  # >= 2 steps per core when 2 cores share the parallel axis
    best = 1
    for bb in range(1, B + 1):
        if B % bb or (B // bb) < min_steps:
            continue
        streamed = sum(2 * bb * _padded_block_bytes(s, itemsize)
                       for s in streamed_2d_shapes)
        if streamed <= budget:
            best = max(best, bb)
    return best


def attention_forward(x, dictionary, S, w_fc1, w_fc2, *, block_b=None):
    """x: (B, N1, C); dictionary: (B, N2, C); S: (B, N2).
    w_fc1, w_fc2: (C, C) PyTorch-style Linear weights (out, in), bias-free."""
    B, N1, C = x.shape
    _, N2, _ = dictionary.shape
    scale = C ** (-0.5)

    # Lane-packing factor: view (N1, C) as (N1/P, P*C) so streamed blocks and the
    # final store are lane-dense (P*C == 128 when C divides 128).  P == 1 is the
    # clean degenerate fallback (same kernel code path).
    P = 1
    for p in range(max(1, 128 // C), 0, -1):
        if N1 % p == 0:
            P = p
            break
    R, PC = N1 // P, P * C

    x_p = x.reshape(B, R, PC)                                   # free contiguous view
    s3 = S.reshape(B, 1, N2).astype(x.dtype)                    # lane-dense S

    # Constant folds (wrapper side, exact): combined weight with scale/N2 folded in,
    # lane-tiled so one in-kernel matmul yields the P-times repeated u vector.
    w_combo = (scale / N2) * (w_fc2.T @ w_fc1)                  # (C, C)
    w_tiled = jnp.tile(w_combo, (1, P)).astype(x.dtype)         # (C, P*C)

    # Group-selection mask: mask[l, j] = 1 iff lane l belongs to token group j.
    lane = jnp.arange(PC, dtype=jnp.int32)[:, None]
    grp = jnp.arange(P, dtype=jnp.int32)[None, :]
    mask = (lane // C == grp).astype(x.dtype)                   # (P*C, P)

    itemsize = jnp.dtype(x.dtype).itemsize
    if block_b is None:
        block_b = _pick_block_b(
            B,
            streamed_2d_shapes=[(R, PC), (R, PC), (N2, C), (1, N2)],  # x, out, dict, S
            fixed_2d_shapes=[(C, PC), (PC, P)],                       # weight, mask
            itemsize=itemsize)
    assert B % block_b == 0, "block_b must divide the batch size"
    grid_b = B // block_b

    out_p = pl.pallas_call(
        _attention_kernel,
        out_shape=jax.ShapeDtypeStruct((B, R, PC), x.dtype),
        grid_spec=pltpu.PrefetchScalarGridSpec(
            num_scalar_prefetch=0,
            grid=(grid_b,),
            in_specs=[
                pl.BlockSpec((block_b, R, PC), lambda b: (b, 0, 0)),   # x (lane-packed)
                pl.BlockSpec((block_b, N2, C), lambda b: (b, 0, 0)),   # dictionary
                pl.BlockSpec((block_b, 1, N2), lambda b: (b, 0, 0)),   # S (lane-dense)
                # Grid-invariant blocks (constant index_map -> no re-DMA per step).
                pl.BlockSpec((C, PC), lambda b: (0, 0)),               # folded weight
                pl.BlockSpec((PC, P), lambda b: (0, 0)),               # group mask
            ],
            out_specs=pl.BlockSpec((block_b, R, PC), lambda b: (b, 0, 0)),
        ),
        compiler_params=pltpu.CompilerParams(
            dimension_semantics=("parallel",),
            vmem_limit_bytes=32 * 1024 * 1024,
        ),
    )(x_p, dictionary, s3, w_tiled, mask)

    return out_p.reshape(B, N1, C)


def _reference(x, dictionary, S, w_fc1, w_fc2):
    """Pure-JAX reference mirroring the PyTorch forward (materializes T)."""
    C = x.shape[-1]
    scale = C ** (-0.5)
    d = dictionary * S[..., None]
    q = jnp.einsum("bnc,oc->bno", x, w_fc1)
    k = jnp.einsum("bnc,oc->bno", d, w_fc2)
    T = jnp.einsum("bio,bjo->bij", q, k) * scale
    tavg = jnp.mean(T, axis=2, keepdims=True)
    tatt = jax.nn.softmax(tavg, axis=1)
    return x * tatt


if __name__ == "__main__":
    B, N1, N2, dim = 2, 8, 8, 32
    key = jax.random.PRNGKey(0)
    kx, kd, ks, k1, k2 = jax.random.split(key, 5)

    x = jax.random.normal(kx, (B, N1, dim), dtype=jnp.float32)
    dictionary = jax.random.normal(kd, (B, N2, dim), dtype=jnp.float32)
    S = jax.random.uniform(ks, (B, N2), dtype=jnp.float32)

    # PyTorch Linear init: U(-1/sqrt(in), 1/sqrt(in)).
    bound = 1.0 / math.sqrt(dim)
    w_fc1 = jax.random.uniform(k1, (dim, dim), jnp.float32, -bound, bound)
    w_fc2 = jax.random.uniform(k2, (dim, dim), jnp.float32, -bound, bound)
    # self.proj is defined in the module but unused in forward(); omitted.

    out = attention_forward(x, dictionary, S, w_fc1, w_fc2)
    jax.block_until_ready(out)

    ref = _reference(x, dictionary, S, w_fc1, w_fc2)
    assert out.shape == (B, N1, dim)
    err = jnp.max(jnp.abs(out - ref))
    assert jnp.allclose(out, ref, atol=5e-5, rtol=5e-4), f"mismatch vs reference (max abs err {err})"

    print("KERNEL_OK")
</pallas_src>

<mosaic_0001>
module attributes {stable_mosaic.version = 11 : i64} {
  func.func @_attention_kernel(%arg0: i32, %arg1: memref<1x2x128xf32, #tpu.memory_space<vmem>>, %arg2: memref<1x8x32xf32, #tpu.memory_space<vmem>>, %arg3: memref<1x1x8xf32, #tpu.memory_space<vmem>>, %arg4: memref<32x128xf32, #tpu.memory_space<vmem>>, %arg5: memref<128x4xf32, #tpu.memory_space<vmem>>, %arg6: memref<1x2x128xf32, #tpu.memory_space<vmem>>) attributes {dimension_semantics = [#tpu.dimension_semantics<parallel>], iteration_bounds = array<i64: 2>, scalar_prefetch = 0 : i64, scratch_operands = 0 : i64, tpu.core_type = #tpu.core_type<tc>, window_params = [{transform_indices = @transform_0, window_bounds = array<i64: 1, 2, 128>}, {transform_indices = @transform_1, window_bounds = array<i64: 1, 8, 32>}, {transform_indices = @transform_2, window_bounds = array<i64: 1, 1, 8>}, {pipeline_mode = #tpu.pipeline_mode<synchronous>, transform_indices = @transform_3, window_bounds = array<i64: 32, 128>}, {pipeline_mode = #tpu.pipeline_mode<synchronous>, transform_indices = @transform_4, window_bounds = array<i64: 128, 4>}, {transform_indices = @transform_5, window_bounds = array<i64: 1, 2, 128>}]} {
    %c0 = arith.constant 0 : index
    %c0_0 = arith.constant 0 : index
    %c0_1 = arith.constant 0 : index
    %0 = vector.load %arg1[%c0, %c0_0, %c0_1] : memref<1x2x128xf32, #tpu.memory_space<vmem>>, vector<1x2x128xf32>
    %c0_2 = arith.constant 0 : index
    %c0_3 = arith.constant 0 : index
    %c0_4 = arith.constant 0 : index
    %1 = vector.load %arg3[%c0_2, %c0_3, %c0_4] : memref<1x1x8xf32, #tpu.memory_space<vmem>>, vector<1x1x8xf32>
    %c0_5 = arith.constant 0 : index
    %c0_6 = arith.constant 0 : index
    %c0_7 = arith.constant 0 : index
    %2 = vector.load %arg2[%c0_5, %c0_6, %c0_7] : memref<1x8x32xf32, #tpu.memory_space<vmem>>, vector<1x8x32xf32>
    "tpu.trace_start"() <{level = 10 : i32, message = "bjn,bnc->bjc"}> : () -> ()
    %cst = arith.constant dense<0.000000e+00> : vector<1x1x32xf32>
    %3 = tpu.matmul %1, %2, %cst {dimension_numbers = #tpu.dot_dimension_numbers<[2], [1], [1], [2], [0, 0, 0, 1, 1, 2], [0], [0]>} : vector<1x1x8xf32>, vector<1x8x32xf32>, vector<1x1x32xf32> -> vector<1x1x32xf32>
    "tpu.trace_stop"() : () -> ()
    %c0_8 = arith.constant 0 : index
    %c0_9 = arith.constant 0 : index
    %4 = vector.load %arg4[%c0_8, %c0_9] : memref<32x128xf32, #tpu.memory_space<vmem>>, vector<32x128xf32>
    %5 = vector.shape_cast %4 : vector<32x128xf32> to vector<1x32x128xf32>
    "tpu.trace_start"() <{level = 10 : i32, message = "bjc,bcl->bjl"}> : () -> ()
    %cst_10 = arith.constant dense<0.000000e+00> : vector<1x1x128xf32>
    %6 = tpu.matmul %3, %5, %cst_10 {dimension_numbers = #tpu.dot_dimension_numbers<[2], [1], [1], [2], [0, 0, 0, 1, 1, 2], [0], [0]>} : vector<1x1x32xf32>, vector<1x32x128xf32>, vector<1x1x128xf32> -> vector<1x1x128xf32>
    "tpu.trace_stop"() : () -> ()
    %7 = vector.broadcast %6 : vector<1x1x128xf32> to vector<1x2x128xf32>
    %8 = arith.mulf %0, %7 : vector<1x2x128xf32>
    %c0_11 = arith.constant 0 : index
    %c0_12 = arith.constant 0 : index
    %9 = vector.load %arg5[%c0_11, %c0_12] : memref<128x4xf32, #tpu.memory_space<vmem>>, vector<128x4xf32>
    %10 = vector.shape_cast %9 : vector<128x4xf32> to vector<1x128x4xf32>
    "tpu.trace_start"() <{level = 10 : i32, message = "brl,blj->brj"}> : () -> ()
    %cst_13 = arith.constant dense<0.000000e+00> : vector<1x2x4xf32>
    %11 = tpu.matmul %8, %10, %cst_13 {dimension_numbers = #tpu.dot_dimension_numbers<[2], [1], [1], [2], [0, 0, 0, 1, 1, 2], [0], [0]>} : vector<1x2x128xf32>, vector<1x128x4xf32>, vector<1x2x4xf32> -> vector<1x2x4xf32>
    "tpu.trace_stop"() : () -> ()
    %cst_14 = arith.constant dense<0xFF800000> : vector<1x2xf32>
    %12 = vector.multi_reduction <maximumf>, %11, %cst_14 [2] : vector<1x2x4xf32> to vector<1x2xf32>
    %13 = vector.shape_cast %12 : vector<1x2xf32> to vector<1x2x1xf32>
    %cst_15 = arith.constant dense<0xFF800000> : vector<1x1xf32>
    %14 = vector.multi_reduction <maximumf>, %13, %cst_15 [1] : vector<1x2x1xf32> to vector<1x1xf32>
    %15 = vector.shape_cast %14 : vector<1x1xf32> to vector<1x1x1xf32>
    %16 = vector.broadcast %15 : vector<1x1x1xf32> to vector<1x2x4xf32>
    %17 = arith.subf %11, %16 : vector<1x2x4xf32>
    %18 = math.exp %17 : vector<1x2x4xf32>
    %cst_16 = arith.constant dense<0.000000e+00> : vector<1x2xf32>
    %19 = vector.multi_reduction <add>, %18, %cst_16 [2] : vector<1x2x4xf32> to vector<1x2xf32>
    %20 = vector.shape_cast %19 : vector<1x2xf32> to vector<1x2x1xf32>
    %cst_17 = arith.constant dense<0.000000e+00> : vector<1x1xf32>
    %21 = vector.multi_reduction <add>, %20, %cst_17 [1] : vector<1x2x1xf32> to vector<1x1xf32>
    %22 = vector.shape_cast %21 : vector<1x1xf32> to vector<1x1x1xf32>
    %23 = vector.broadcast %22 : vector<1x1x1xf32> to vector<1x2x4xf32>
    %24 = arith.divf %18, %23 : vector<1x2x4xf32>
    "tpu.trace_start"() <{level = 10 : i32, message = "brj,blj->brl"}> : () -> ()
    %cst_18 = arith.constant dense<0.000000e+00> : vector<1x2x128xf32>
    %25 = tpu.matmul %24, %10, %cst_18 {dimension_numbers = #tpu.dot_dimension_numbers<[2], [2], [1], [1], [0, 0, 0, 1, 1, 1], [0], [0]>} : vector<1x2x4xf32>, vector<1x128x4xf32>, vector<1x2x128xf32> -> vector<1x2x128xf32>
    "tpu.trace_stop"() : () -> ()
    %26 = arith.mulf %0, %25 : vector<1x2x128xf32>
    %c0_19 = arith.constant 0 : index
    %c0_20 = arith.constant 0 : index
    %c0_21 = arith.constant 0 : index
    %27 = vector.load %arg6[%c0_19, %c0_20, %c0_21] : memref<1x2x128xf32, #tpu.memory_space<vmem>>, vector<1x2x128xf32>
    tpu.vector_store %arg6[%c0_19, %c0_20, %c0_21], %26 {strides = array<i32>} : memref<1x2x128xf32, #tpu.memory_space<vmem>>, vector<1x2x128xf32>,
    return
  }
  func.func @transform_0(%arg0: i32) -> (i32, i32, i32) {
    %c0_i32 = arith.constant 0 : i32
    %c0_i32_0 = arith.constant 0 : i32
    %c0_i32_1 = arith.constant 0 : i32
    return %arg0, %c0_i32, %c0_i32_0 : i32, i32, i32
  }
  func.func @transform_1(%arg0: i32) -> (i32, i32, i32) {
    %c0_i32 = arith.constant 0 : i32
    %c0_i32_0 = arith.constant 0 : i32
    %c0_i32_1 = arith.constant 0 : i32
    return %arg0, %c0_i32, %c0_i32_0 : i32, i32, i32
  }
  func.func @transform_2(%arg0: i32) -> (i32, i32, i32) {
    %c0_i32 = arith.constant 0 : i32
    %c0_i32_0 = arith.constant 0 : i32
    %c0_i32_1 = arith.constant 0 : i32
    return %arg0, %c0_i32, %c0_i32_0 : i32, i32, i32
  }
  func.func @transform_3(%arg0: i32) -> (i32, i32) {
    %c0_i32 = arith.constant 0 : i32
    %c0_i32_0 = arith.constant 0 : i32
    %c0_i32_1 = arith.constant 0 : i32
    return %c0_i32, %c0_i32_0 : i32, i32
  }
  func.func @transform_4(%arg0: i32) -> (i32, i32) {
    %c0_i32 = arith.constant 0 : i32
    %c0_i32_0 = arith.constant 0 : i32
    %c0_i32_1 = arith.constant 0 : i32
    return %c0_i32, %c0_i32_0 : i32, i32
  }
  func.func @transform_5(%arg0: i32) -> (i32, i32, i32) {
    %c0_i32 = arith.constant 0 : i32
    %c0_i32_0 = arith.constant 0 : i32
    %c0_i32_1 = arith.constant 0 : i32
    return %arg0, %c0_i32, %c0_i32_0 : i32, i32, i32
  }
}

</mosaic_0001>

<bundles_post_ra>
// kernel: tpu_custom_call.1
= control target key start
LH: loop header
LB: loop body
LE: loop exit
PB: predicated region body
PF: predicated region fallthrough
CT: control target
= control target key end

     0   :  { %10 = vsyncpa [#allocation3], 0  ;;  %s1305_s0 = inlined_call_operand.vmem [shape: f32[2,2,128], index: 0, kind: input, shape index: {}]   ;;  %s1306_s1 = inlined_call_operand.vmem [shape: f32[2,8,32], index: 1, kind: input, shape index: {}]   ;;  %s1307_s2 = inlined_call_operand.vmem [shape: f32[2,1,8], index: 2, kind: input, shape index: {}]   ;;  %s1308_s3 = inlined_call_operand.vmem [shape: f32[32,128], index: 3, kind: input, shape index: {}]   ;;  %s1309_s4 = inlined_call_operand.vmem [shape: f32[128,4], index: 4, kind: input, shape index: {}]   ;;  %s1310_s5 = inlined_call_operand.hbm [shape: f32[2,2,128], index: 5, kind: output, shape index: {}]  }
   0x1   :  { %12 = vsyncpa [#allocation3 + $0x1], 0  ;;  %s1105_s18 = smov 0   ;;  %s1107_s19 = smov 0  }
   0x2   :  { %s1109_s20 = smov 0   ;;  %s1111_s21 = smov 0  }
   0x3 LB: > { %s1126_s22 = sadd.s32 4294967295, %s1069_s21   ;;  %s742_s23 = sadd.s32 4294967294, %s1069_s21   ;;  %s1069_s21 = sphi %s1111_s21, %s1316_s21   ;;  %s1065_s20 = sphi %s1109_s20, %s1315_s20   ;;  %s1061_s19 = sphi %s1107_s19, %s1314_s19   ;;  %s1057_s18 = sphi %s1105_s18, %s1313_s18  }
   0x4   : > { %s1130_s24 = sadd.s32 1, %s1069_s21   ;;  %s145_s25 = sadd.s32 1, %s1065_s20 }
   0x5   : > { %s142_s26 = ssub.s32 %s1069_s21, %s1130_s24  ;;  %p155_p0 = scmp.ne.s32.totalorder %s1065_s20, %s1061_s19 }
   0x6   : > { %p143_p1 = scmp.eq.s32.totalorder %s142_s26, 0  ;;  %p156_p2 = scmp.eq.s32.totalorder %s1126_s22, 1 }
   0x7   : > { %p161_p3 = scmp.ne.s32.totalorder %s1061_s19, %s1057_s18  ;;  %p162_p4 = scmp.eq.s32.totalorder %s742_s23, 1 }
   0x8   : > { %s1141_s27 = scalar_select %p143_p1, %s1065_s20, %s145_s25  }
   0x9   : > { %p1143_p5 = por %p156_p2, %p155_p0  ;;  %p1147_p6 = por %p162_p4, %p161_p3 }
   0xa   : > { %p745_p7 = scmp.ge.s32.totalorder %s1069_s21, 1  ;;  %p206_p8 = scmp.lt.s32.totalorder %s1069_s21, 3 }
   0xc   : > { %p207_p9 = pnand %p745_p7, %p206_p8 }
   0xd   : > { %p240_p10 = scmp.lt.s32.totalorder (!%p207_p9), %s1126_s22, 1  ;;  %v1071_v0 = vmov (!%p207_p9), 0.0   ;;  %vm1072_vm0 = vmmov (!%p207_p9), 0   ;;  %v328_v1 = vld [vmem:[%s1308_s3] sm:$0xff] (!%p207_p9)  ;;  %v329_v2 = vld [vmem:[%s1308_s3 + $0x8] sm:$0xff] (!%p207_p9)  ;;  %v1073_v3 = vmov (!%p207_p9), 0.0|0.0   ;;  %v406_v36 = vlaneseq (!%p207_p9) }
   0xe   : > { %210 = sbr.rel (%p207_p9) target bundleno = 1235 (0x4d3), region = 40  ;;  %813 = vmatprep.subr.mxu0 (!%p207_p9), %v1071_v0  ;;  %815 = vmatprep.mubr.msk.f32.mxu0 (!%p207_p9), %vm1072_vm0, %v1071_v0  ;;  %vm254_vm1 = vcmask (!%p207_p9), 64512   ;;  %v900_v5 = vpack.c.bf16 (!%p207_p9), %v329_v2, %v328_v1  ;;  %v330_v7 = vld [vmem:[%s1308_s3 + $0x10] sm:$0xff] (!%p207_p9)  ;;  %v331_v8 = vld [vmem:[%s1308_s3 + $0x18] sm:$0xff] (!%p207_p9)  ;;  %v411_v10 = vld [vmem:[%s1309_s4] sm:$0xff] (!%p207_p9)  ;;  %vm332_vm2 = vcmask (!%p207_p9), 261120  }
   0xf   : > { %929 = vmatprep.subr.bf16.mxu1 (!%p207_p9), %v1073_v3  ;;  %896 = vmatprep.mubr.msk.f32.mxu1 (!%p207_p9), %vm1072_vm0, %v1071_v0  ;;  %v903_v9 = vpack.c.bf16 (!%p207_p9), %v331_v8, %v330_v7  ;;  %v412_v11 = vld [vmem:[%s1309_s4 + $0x8] sm:$0xff] (!%p207_p9)  ;;  %v413_v13 = vld [vmem:[%s1309_s4 + $0x10] sm:$0xff] (!%p207_p9)  ;;  %v414_v14 = vld [vmem:[%s1309_s4 + $0x18] sm:$0xff] (!%p207_p9)  ;;  %v407_v37 = vshrl.u32 (!%p207_p9), %v406_v36, 7  ;;  %vm497_vm3 = vcmask (!%p207_p9), 25600   ;;  %vm524_vm4 = vcmask (!%p207_p9), 31744  }
  0x10   : > { %v906_v12 = vpack.c.bf16 (!%p207_p9), %v412_v11, %v411_v10  ;;  %v909_v17 = vpack.c.bf16 (!%p207_p9), %v414_v14, %v413_v13  ;;  %v415_v18 = vld [vmem:[%s1309_s4 + $0x20] sm:$0xff] (!%p207_p9)  ;;  %v416_v19 = vld [vmem:[%s1309_s4 + $0x28] sm:$0xff] (!%p207_p9)  ;;  %v417_v21 = vld [vmem:[%s1309_s4 + $0x30] sm:$0xff] (!%p207_p9)  ;;  %vm501_vm6 = vcmask (!%p207_p9), 1041408  }
  0x11   : > { %v912_v20 = vpack.c.bf16 (!%p207_p9), %v416_v19, %v415_v18  ;;  %v418_v22 = vld [vmem:[%s1309_s4 + $0x38] sm:$0xff] (!%p207_p9)  ;;  %v419_v24 = vld [vmem:[%s1309_s4 + $0x40] sm:$0xff] (!%p207_p9)  ;;  %v420_v25 = vld [vmem:[%s1309_s4 + $0x48] sm:$0xff] (!%p207_p9)  ;;  %v408_v38 = vsub.s32 (!%p207_p9), 0, %v407_v37 }
  0x12   : > { %v915_v23 = vpack.c.bf16 (!%p207_p9), %v418_v22, %v417_v21  ;;  %v918_v26 = vpack.c.bf16 (!%p207_p9), %v420_v25, %v419_v24  ;;  %v421_v27 = vld [vmem:[%s1309_s4 + $0x50] sm:$0xff] (!%p207_p9)  ;;  %v422_v28 = vld [vmem:[%s1309_s4 + $0x58] sm:$0xff] (!%p207_p9)  ;;  %v423_v30 = vld [vmem:[%s1309_s4 + $0x60] sm:$0xff] (!%p207_p9) }
  0x13   : > { %v921_v29 = vpack.c.bf16 (!%p207_p9), %v422_v28, %v421_v27  ;;  %v424_v31 = vld [vmem:[%s1309_s4 + $0x68] sm:$0xff] (!%p207_p9)  ;;  %v425_v33 = vld [vmem:[%s1309_s4 + $0x70] sm:$0xff] (!%p207_p9)  ;;  %v426_v34 = vld [vmem:[%s1309_s4 + $0x78] sm:$0xff] (!%p207_p9) }
  0x14   : > { %v924_v32 = vpack.c.bf16 (!%p207_p9), %v424_v31, %v423_v30  ;;  %v927_v35 = vpack.c.bf16 (!%p207_p9), %v426_v34, %v425_v33  ;;  %vm931_vm5 = vmpackc.low (!%p207_p9), %vm524_vm4, %vm524_vm4 }
  0x15   : > { %s1156_s30 = scalar_select %p240_p10, %s1126_s22, 1  ;;  %932 = vmatpush3.bf16.xpose.msk.msra.mxu1 %vm931_vm5, %v906_v12 }
  0x16   : > { %933 = vmatprep.subr.bf16.mxu1 %v1073_v3 }
  0x17   : > { %s748_s10 = sshll.u32 %s1156_s30, 3  ;;  %s250_s13 = scalar_lea.vmem %s1307_s2, %s1156_s30 }
  0x18   : > { %s247_s16 = scalar_lea.vmem %s1306_s1, %s748_s10  ;;  %v252_v4 = vld [vmem:[%s250_s13] sm:$0x1]  ;;  %s747_s8 = sshll.u32 %s1156_s30, 1 }
  0x19   : > { %v253_v6 = vld [vmem:[%s247_s16] sm:$0xff]  ;;  %s243_s11 = scalar_lea.vmem %s1305_s0, %s747_s8  ;;  %s237_s30 = sand.u32 1, %s1061_s19  }
  0x1a   : > { %814 = vmatpush3.msra.mxu0 %v253_v6  ;;  %v251_v39 = vld [vmem:[%s243_s11] sm:$0x3]  ;;  %s746_s12 = sshll.u32 %s237_s30, 1  ;;  %s769_s13 = sshll.u32 %s1126_s22, 5 }
  0x1b   : > { %816 = vmatmul.mubr.msk.f32.vlgmr.msra.gmra.mrb[0].mxu0 %vm254_vm1, %v252_v4  ;;  %899 = vmatprep.subr.bf16.mxu0 %v1073_v3  ;;  %s239_s14 = scalar_lea.vmem [#allocation2], %s746_s12  ;;  %s1263_s23 = scalar_lea.hbm %s1310_s5, %s769_s13 }
  0x1c   : > { %901 = vmatpush3.bf16.msra.mxu0 %v900_v5  ;;  %826 = vmatprep.mubr.msk.f32.mxu0 %vm1072_vm0, %v1071_v0  ;;  %s662_s15 = sshll.u32 %s239_s14, 4  ;;  %s649_s25 = scalar_lea.sflag [#allocation3], %s237_s30  ;;  %s1265_s15 = int_to_ptr.vmem [resolvable:$true] %s662_s15 }
  0x1d   : > { %902 = vmatprep.subr.bf16.mxu0 %v1073_v3  ;;  %936 = vmatpush3.bf16.xpose.msk.msra.mxu1 %vm931_vm5, %v909_v17  ;;  %s1007_s26 = scalar_lea.vmem %s1265_s15, 32  ;;  %s1074_s22 = smov [#allocation2]  }
  0x1e   : > { %937 = vmatprep.subr.bf16.mxu1 %v1073_v3  ;;  %p1008_p11 = scmp.ne.s32.totalorder %s1265_s15, %s1007_s26  ;;  %s1011_s6 = sshll.u32 %s1074_s22, 4  ;;  %s1012_s6 = int_to_ptr.vmem [resolvable:$false] %s1011_s6 }
  0x1f   : > { %s1013_s7 = scalar_lea.vmem %s1012_s6, 64  ;;  %p1014_p0 = scmp.lt.s32.totalorder %s1265_s15, %s1012_s6 }
  0x20   : > { %904 = vmatpush3.bf16.msra.mxu0 %v903_v9  ;;  %p1009_p12 = pnand %p1008_p11, %p1143_p5  ;;  %p1015_p1 = scmp.lt.s32.totalorder %s1013_s7, %s1007_s26 }
  0x21   : > { %905 = vmatprep.subr.bf16.mxu0 %v1073_v3 }
  0x22   : > { %p1010_p13 = pneg %p1009_p12  ;;  %p1016_p2 = por %p1015_p1, %p1014_p0 }
  0x24   : > { %p1017_p3 = pnand %p1016_p2, %p1010_p13 }
  0x25   : > { %940 = vmatpush3.bf16.xpose.msk.msra.mxu1 %vm931_vm5, %v912_v20 }
  0x26   : > { %941 = vmatprep.subr.bf16.mxu1 %v1073_v3 }
  0x2d   : > { %944 = vmatpush3.bf16.xpose.msk.msra.mxu1 %vm931_vm5, %v915_v23 }
  0x2e   : > { %945 = vmatprep.subr.bf16.mxu1 %v1073_v3 }
  0x35   : > { %948 = vmatpush3.bf16.xpose.msk.msra.mxu1 %vm931_vm5, %v918_v26 }
  0x36   : > { %949 = vmatprep.subr.bf16.mxu1 %v1073_v3 }
  0x3d   : > { %952 = vmatpush3.bf16.xpose.msk.msra.mxu1 %vm931_vm5, %v921_v29 }
  0x3e   : > { %953 = vmatprep.subr.bf16.mxu1 %v1073_v3 }
  0x45   : > { %956 = vmatpush3.bf16.xpose.msk.msra.mxu1 %vm931_vm5, %v924_v32 }
  0x46   : > { %957 = vmatprep.subr.bf16.mxu1 %v1073_v3 }
  0x4d   : > { %960 = vmatpush3.bf16.xpose.msk.msra.mxu1 %vm931_vm5, %v927_v35 }
  0xee   : > { %v324_v15 = vpop.f32.mrb[0].mxu0 }
  0xef   : > { %v817_v16 = vpop.f32.mrb[1].mxu0  ;;  %827 = vmatmul.mubr.msk.f32.vlgmr.msra.gmra.mrb[2].mxu0 %vm332_vm2, %v324_v15 }
  0xf0   : > { %907 = vmatpush3.bf16.msra.mxu0 %v906_v12  ;;  %861 = vmatprep.mubr.msk.f32.mxu0 %vm1072_vm0, %v1071_v0 }
  0xf1   : > { %908 = vmatprep.subr.bf16.mxu0 %v1073_v3 }
  0xf4   : > { %910 = vmatpush3.bf16.msra.mxu0 %v909_v17 }
  0xf5   : > { %911 = vmatprep.subr.bf16.mxu0 %v1073_v3 }
  0xf8   : > { %913 = vmatpush3.bf16.msra.mxu0 %v912_v20 }
  0xf9   : > { %914 = vmatprep.subr.bf16.mxu0 %v1073_v3 }
  0xfc   : > { %916 = vmatpush3.bf16.msra.mxu0 %v915_v23 }
  0xfd   : > { %917 = vmatprep.subr.bf16.mxu0 %v1073_v3 }
 0x100   : > { %919 = vmatpush3.bf16.msra.mxu0 %v918_v26 }
 0x101   : > { %920 = vmatprep.subr.bf16.mxu0 %v1073_v3 }
 0x104   : > { %922 = vmatpush3.bf16.msra.mxu0 %v921_v29 }
 0x105   : > { %923 = vmatprep.subr.bf16.mxu0 %v1073_v3 }
 0x108   : > { %925 = vmatpush3.bf16.msra.mxu0 %v924_v32 }
 0x109   : > { %926 = vmatprep.subr.bf16.mxu0 %v1073_v3 }
 0x10c   : > { %928 = vmatpush3.bf16.msra.mxu0 %v927_v35 }
 0x1c2   : > { %v402_v40 = vpop.f32.mrb[2].mxu0 }
 0x1c3   : > { %v409_v41 = vrot.slane %v402_v40, %v408_v38  ;;  %v828_v42 = vpop.f32.mrb[3].mxu0 }
 0x1c5   : > { %v410_v43 = vmul.f32 %v409_v41, %v251_v39 }
 0x1c7   : > { %862 = vmatmul.mubr.f32.vlgmr.msra.gmra.mrb[4].mxu0 %v410_v43 }
 0x29a   : > { %v493_v44 = vpop.f32.mrb[4].mxu0 }
 0x29b   : > { %v863_v45 = vpop.f32.mrb[5].mxu0  ;;  %v498_v46 = vsel %vm497_vm3, %v493_v44, -inf }
 0x29c   : > { %499 = vmax.xlane.f32.xlu0 %v498_v46 }
 0x329   : > { %v500_v47 = vpop.xlane.xlu0 %499 }
 0x32a   : > { %v502_v48 = vsel %vm501_vm6, %v500_v47, -inf }
 0x32b   : > { %v503_v49 = vrot.slane %v502_v48, 4 }
 0x32d   : > { %v504_v50 = vmax.f32 %v502_v48, %v503_v49 }
 0x32f   : > { %v505_v51 = vrot.slane %v504_v50, 2 }
 0x331   : > { %v506_v52 = vmax.f32 %v504_v50, %v505_v51 }
 0x333   : > { %v507_v53 = vrot.slane %v506_v52, 1 }
 0x335   : > { %v508_v54 = vmax.f32 %v506_v52, %v507_v53 }
 0x337   : > { %v509_v55 = vsub.f32 %v493_v44, %v508_v54 }
 0x339   : > { %v510_v56 = vmul.f32 1.442695, %v509_v55 }
 0x33b   : > { %1003 = vpow2.f32 %v510_v56 }
 0x345   : > { %v1004_v57 = vpop.eup %1003 }
 0x346   : > { %v512_v58 = vsel %vm497_vm3, %v1004_v57, 0.0 }
 0x347   : > { %513 = vadd.xlane.f32.xlu0 %v512_v58 }
 0x3d4   : > { %v514_v59 = vpop.xlane.xlu0 %513 }
 0x3d5   : > { %v515_v60 = vsel %vm501_vm6, %v514_v59, 0.0 }
 0x3d6   : > { %v516_v61 = vrot.slane %v515_v60, 4 }
 0x3d8   : > { %v517_v62 = vadd.f32 %v516_v61, %v515_v60 }
 0x3da   : > { %v518_v63 = vrot.slane %v517_v62, 2 }
 0x3dc   : > { %v519_v0 = vadd.f32 %v518_v63, %v517_v62 }
 0x3de   : > { %v520_v1 = vrot.slane %v519_v0, 1 }
 0x3e0   : > { %v521_v2 = vadd.f32 %v520_v1, %v519_v0 }
 0x3e2   : > { %1005 = vrcp.f32 %v521_v2 }
 0x3ec   : > { %v1006_v3 = vpop.eup %1005 }
 0x3ed   : > { %v523_v4 = vmul.f32 %v1006_v3, %v1004_v57 }
 0x3ef   : > { %897 = vmatmul.mubr.msk.f32.vlgmr.msra.gmra.mrb[0].mxu1 %vm524_vm4, %v523_v4 }
 0x4c2   : > { %v642_v5 = vpop.f32.mrb[0].mxu1 }
 0x4c3   : > { %v646_v6 = vmul.f32 %v642_v5, %v251_v39  ;;  %v898_v7 = vpop.f32.mrb[1].mxu1 }
 0x4c5   : > { %647 = vst [vmem:[%s239_s14] sm:$0x3] %v646_v6 }
 0x4c6   : > { %1020 = shalt.err (!%p1017_p3)
}
 0x4c7   : > { %s1021_s8 = scalar_lea.hbm %s1263_s23, 32  ;;  %s1025_s11 = scalar_lea.hbm %s1310_s5, 64 }
 0x4c8   : > { %p1022_p4 = scmp.ne.s32.totalorder %s1263_s23, %s1021_s8  ;;  %p1026_p9 = scmp.lt.u32.totalorder %s1263_s23, %s1310_s5 }
 0x4c9   : > { %p1027_p10 = scmp.lt.u32.totalorder %s1025_s11, %s1021_s8  ;;  %p1029_p12 = scmp.lt.u32.totalorder %s1021_s8, %s1263_s23 }
 0x4ca   : > { %p1023_p7 = pnand %p1022_p4, %p1143_p5 }
 0x4cb   : > { %p1028_p11 = por %p1027_p10, %p1026_p9 }
 0x4cc   : > { %p1024_p8 = pneg %p1023_p7 }
 0x4cd   : > { %p1030_p13 = por %p1029_p12, %p1028_p11 }
 0x4cf   : > { %p1031_p0 = pnand %p1030_p13, %p1024_p8 }
 0x4d1   : > { %1034 = shalt.err (!%p1031_p0)
}
 0x4d2   : > { %961 = dma.vmem_to_hbm [thread:$0]  (%p1143_p5), %s1265_s15, 32, %s1263_s23, %s649_s25  }
 0x4d3 PF: > { %p967_p1 = scmp.ge.s32.totalorder %s1069_s21, 2  ;;  %s674_s13 = sand.u32 1, %s1057_s18  }
 0x4d4   : > { %s675_s14 = scalar_lea.sflag [#allocation3], %s674_s13 }
 0x4d5   : > { %p964_p2 = pnand %p967_p1, %p1147_p6 }
 0x4d7   : > { %1052 = dma.done.wait (!%p964_p2), %s675_s14, 32  }
 0x4d8   : > { %1054 = vsyncadd (!%p964_p2), %s675_s14, 4294967264  ;;  %p15_p3 = scmp.ge.s32.totalorder %s1130_s24, 4   ;;  %s1313_s18 = smov %s1061_s19 }
 0x4d9   : > { %s1314_s19 = smov %s1065_s20  ;;  %s1315_s20 = smov %s1141_s27 }
 0x4da   : > { %s1316_s21 = smov %s1130_s24  ;;  %17 = sbr.rel (!%p15_p3) target bundleno = 3 (0x3), region = 81 }
 0x4e1   :  { %680 = vsyncpa [#allocation3], 1 }
 0x4e2   :  { %682 = vsyncpa [#allocation3 + $0x1], 1 }

</bundles_post_ra>
